<compile_context>
chip_gen: v7x
topology: tpu7x:2x2x1
jax: 0.10.0
libtpu: 0.0.40
codegen_flags: <defaults>
</compile_context>

<pallas_src>
import functools

import jax
import jax.numpy as jnp
from jax.experimental import pallas as pl
from jax.experimental.pallas import tpu as pltpu


def _relu_kernel(x_ref, o_ref):
    # Elementwise max(x, 0) on the VPU over the whole VMEM tile.
    # Dtype-matched zero so fp8 / unsigned inputs never upcast in-kernel.
    o_ref[...] = jnp.maximum(x_ref[...], jnp.zeros((), x_ref.dtype))


# Candidate lane-dense column widths (largest first). All multiples of 128.
_COL_CANDIDATES = (4096, 2048, 1024, 512, 256, 128)

# Minimum number of grid steps we want for large arrays (pipelining + v7x
# megacore sharding of the "parallel" axis).
_MIN_GRID_STEPS = 4


@functools.lru_cache(maxsize=1)
def _block_policy():
    """Returns (target_block_bytes, vmem_limit_bytes_or_None) per generation."""
    kind = ""
    try:
        kind = jax.devices()[0].device_kind.lower()
    except Exception:  # pragma: no cover - CPU/interpret fallback
        pass
    if "v7" in kind:
        # 6 MiB blocks -> 24 MiB with in+out double buffering, under an
        # explicit 48 MiB scoped-VMEM limit (64 MiB physical on v7x).
        return 6 << 20, 48 << 20
    if "v6" in kind:
        # 4 MiB blocks -> 16 MiB with double buffering, under the 32 MiB
        # scoped default.
        return 4 << 20, None
    if "v5" in kind:
        # v5e scoped default is only 16 MiB; 2 MiB blocks (8 MiB in flight)
        # are already well amortized at ~820 GB/s.
        return 2 << 20, None
    # Unknown generation: conservative.
    return 2 << 20, None


def _relu_xla(x: jax.Array) -> jax.Array:
    return jnp.maximum(x, jnp.zeros((), x.dtype))


def relu(
    x: jax.Array,
    *,
    min_pallas_bytes: int = 1 << 20,
    donate: bool = False,
) -> jax.Array:
    """ReLU over an arbitrarily shaped array via a tiled Pallas kernel.

    Falls back to plain XLA `jnp.maximum` for tiny inputs (< min_pallas_bytes)
    and for element counts that are not a multiple of 128 (a pad+slice pair
    around the custom call would triple HBM traffic for a bandwidth-bound op).
    Set `donate=True` only when the caller donates `x` (aliases output onto
    the input buffer via input_output_aliases).
    """
    orig_shape = x.shape
    n = x.size
    if n == 0:
        return x

    itemsize = jnp.dtype(x.dtype).itemsize

    # Small-input fast path: dispatch + pipeline prologue dominate tiny arrays,
    # and XLA can fuse the max into the producer.
    if n * itemsize < min_pallas_bytes:
        return _relu_xla(x)

    # Pick the widest lane-dense column count that divides n exactly, so the
    # reshape is a free view (no HBM copy).
    cols = None
    for c in _COL_CANDIDATES:
        if n % c == 0:
            cols = c
            break
    if cols is None:
        # Not a multiple of 128: XLA's fused elementwise max is already at
        # roofline; a pad + slice pair would cost ~3x the HBM traffic.
        return _relu_xla(x)

    x2d = x.reshape(n // cols, cols)
    rows = x2d.shape[0]

    # Sublane packing: 8 rows for 32-bit, 16 for 16-bit, 32 for 8-bit dtypes.
    sublane = 8 * max(1, 4 // max(1, itemsize))

    target_block_bytes, vmem_limit_bytes = _block_policy()

    # Block rows: biggest multiple of the sublane packing near the per-
    # generation block-byte target (in+out double buffering = 4x block bytes).
    tile_rows = (target_block_bytes // (cols * itemsize)) // sublane * sublane
    tile_rows = max(sublane, tile_rows)

    # Clamp so the grid has at least _MIN_GRID_STEPS steps for arrays larger
    # than a few MiB: keeps the software pipeline active (overlapped DMA) and
    # lets v7x shard the "parallel" grid axis across both TensorCores.
    total_bytes = rows * cols * itemsize
    if total_bytes > 4 << 20:
        cap = (rows // _MIN_GRID_STEPS) // sublane * sublane
        if cap >= sublane:
            tile_rows = min(tile_rows, cap)

    if tile_rows >= rows:
        # Full-extent block (equal to array dims satisfies the (8,128) rule
        # even for small/odd row counts); single grid step.
        tile_rows = rows
        grid = (1,)
    else:
        # Ragged last block handled by Pallas; no row padding needed.
        grid = (pl.cdiv(rows, tile_rows),)

    cost = pl.CostEstimate(
        flops=rows * cols,
        transcendentals=0,
        bytes_accessed=2 * rows * cols * itemsize,
    )

    out2d = pl.pallas_call(
        _relu_kernel,
        out_shape=jax.ShapeDtypeStruct((rows, cols), x.dtype),
        grid=grid,
        in_specs=[pl.BlockSpec((tile_rows, cols), lambda i: (i, 0))],
        out_specs=pl.BlockSpec((tile_rows, cols), lambda i: (i, 0)),
        compiler_params=pltpu.CompilerParams(
            dimension_semantics=("parallel",),
            vmem_limit_bytes=vmem_limit_bytes,
        ),
        cost_estimate=cost,
        input_output_aliases=({0: 0} if donate else {}),
    )(x2d)

    return out2d.reshape(orig_shape)


class ReLU:
    """Mirror of the PyTorch nn.Module (no parameters)."""

    def __init__(self):
        pass

    def __call__(self, x: jax.Array) -> jax.Array:
        return relu(x)


if __name__ == "__main__":
    key = jax.random.PRNGKey(0)
    mod = ReLU()

    # Primary NCHW-style input consistent with typical conv activations.
    # Default policy routes this 8 KiB input through the XLA fast path ...
    x = jax.random.normal(key, (2, 4, 16, 16), dtype=jnp.float32)
    y = jax.block_until_ready(mod(x))
    ref = jnp.maximum(x, 0.0)
    assert y.shape == x.shape and y.dtype == x.dtype
    assert bool(jnp.allclose(y, ref))

    # ... so also force the Pallas kernel path on the same small input.
    yk = jax.block_until_ready(relu(x, min_pallas_bytes=0))
    assert yk.shape == x.shape and yk.dtype == x.dtype
    assert bool(jnp.allclose(yk, ref))

    # bf16 kernel path (single-step grid, full-extent block).
    xb = jax.random.normal(jax.random.PRNGKey(1), (16, 8, 1024), dtype=jnp.bfloat16)
    yb = jax.block_until_ready(relu(xb, min_pallas_bytes=0))
    refb = jnp.maximum(xb, jnp.zeros((), jnp.bfloat16))
    assert yb.shape == xb.shape and yb.dtype == xb.dtype
    assert bool(jnp.allclose(yb, refb))

    # Mid-size array (8 MiB): exercises the multi-step pipelined grid and the
    # >=4-step clamp with the default policy.
    xm = jax.random.normal(jax.random.PRNGKey(2), (512, 4096), dtype=jnp.float32)
    ym = jax.block_until_ready(mod(xm))
    refm = jnp.maximum(xm, 0.0)
    assert ym.shape == xm.shape and ym.dtype == xm.dtype
    assert bool(jnp.allclose(ym, refm))

    # Non-128-divisible element count: routed to the XLA fallback (no
    # pad+slice around the custom call).
    xo = jax.random.normal(jax.random.PRNGKey(3), (3, 5, 7, 11), dtype=jnp.float32)
    yo = jax.block_until_ready(mod(xo))
    refo = jnp.maximum(xo, 0.0)
    assert yo.shape == xo.shape and yo.dtype == xo.dtype
    assert bool(jnp.allclose(yo, refo))

    print("KERNEL_OK")
</pallas_src>

<mosaic_0001>
module attributes {stable_mosaic.version = 11 : i64} {
  func.func @_relu_kernel(%arg0: i32, %arg1: memref<1x2048xf32, #tpu.memory_space<vmem>>, %arg2: memref<1x2048xf32, #tpu.memory_space<vmem>>) attributes {dimension_semantics = [#tpu.dimension_semantics<parallel>], iteration_bounds = array<i64: 1>, scalar_prefetch = 0 : i64, scratch_operands = 0 : i64, tpu.core_type = #tpu.core_type<tc>, window_params = [{transform_indices = @transform_0, window_bounds = array<i64: 1, 2048>}, {transform_indices = @transform_1, window_bounds = array<i64: 1, 2048>}]} {
    %c0 = arith.constant 0 : index
    %c0_0 = arith.constant 0 : index
    %0 = vector.load %arg1[%c0, %c0_0] : memref<1x2048xf32, #tpu.memory_space<vmem>>, vector<1x2048xf32>
    %cst = arith.constant 0.000000e+00 : f32
    %1 = vector.broadcast %cst : f32 to vector<1x2048xf32>
    %2 = arith.maximumf %0, %1 : vector<1x2048xf32>
    %c0_1 = arith.constant 0 : index
    %c0_2 = arith.constant 0 : index
    %3 = vector.load %arg2[%c0_1, %c0_2] : memref<1x2048xf32, #tpu.memory_space<vmem>>, vector<1x2048xf32>
    tpu.vector_store %arg2[%c0_1, %c0_2], %2 {strides = array<i32>} : memref<1x2048xf32, #tpu.memory_space<vmem>>, vector<1x2048xf32>,
    return
  }
  func.func @transform_0(%arg0: i32) -> (i32, i32) {
    %c0_i32 = arith.constant 0 : i32
    %c0_i32_0 = arith.constant 0 : i32
    return %arg0, %c0_i32 : i32, i32
  }
  func.func @transform_1(%arg0: i32) -> (i32, i32) {
    %c0_i32 = arith.constant 0 : i32
    %c0_i32_0 = arith.constant 0 : i32
    return %arg0, %c0_i32 : i32, i32
  }
}

</mosaic_0001>

<bundles_post_ra>
// kernel: tpu_custom_call.1
= control target key start
LH: loop header
LB: loop body
LE: loop exit
PB: predicated region body
PF: predicated region fallthrough
CT: control target
= control target key end

     0   :  { %6 = vsyncpa [#allocation3], 0  ;;  %s128_s0 = inlined_call_operand.hbm [shape: f32[1,2048], index: 0, kind: input, shape index: {}]   ;;  %s129_s1 = inlined_call_operand.hbm [shape: f32[1,2048], index: 1, kind: output, shape index: {}]  }
   0x1   :  { %7 = vsyncpa [#allocation4], 0  ;;  %s92_s6 = smov [#allocation2]   ;;  %s44_s10 = scalar_lea.hbm %s128_s0, 256 }
   0x2   :  { %s14_s7 = sshll.u32 %s92_s6, 4  ;;  %p45_p0 = scmp.ne.s32.totalorder %s128_s0, %s44_s10  ;;  %s15_s7 = int_to_ptr.vmem [resolvable:$true] %s14_s7 }
   0x3   :  { %p48_p1 = scmp.lt.u32.totalorder %s44_s10, %s128_s0 }
   0x5   :  { %p50_p2 = pnand %p48_p1, %p45_p0 }
   0x7   :  { %53 = shalt.err (!%p50_p2)
}
   0x8   :  { %s54_s15 = scalar_lea.vmem %s15_s7, 256  ;;  %p59_p4 = scmp.lt.s32.totalorder %s15_s7, %s15_s7 }
   0x9   :  { %p55_p3 = scmp.ne.s32.totalorder %s15_s7, %s54_s15  ;;  %p60_p5 = scmp.lt.s32.totalorder %s54_s15, %s54_s15 }
   0xb   :  { %p61_p6 = por %p60_p5, %p59_p4 }
   0xd   :  { %p62_p7 = pnand %p61_p6, %p55_p3 }
   0xf   :  { %65 = shalt.err (!%p62_p7)
}
  0x10   :  { %17 = dma.hbm_to_vmem [thread:$0]  %s128_s0, 256, %s15_s7, [#allocation3]  }
  0x11   :  { %88 = dma.done.wait [#allocation3], 256  }
  0x12   :  { %89 = vsyncadd [#allocation3], 4294967040  ;;  %s93_s18 = smov [#allocation5]   ;;  %v21_v0 = vld [vmem:[#allocation2] sm:$0xff]  ;;  %v22_v1 = vld [vmem:[#allocation2 + $0x8] sm:$0xff] }
  0x13   :  { %s33_s19 = sshll.u32 %s93_s18, 4  ;;  %v23_v2 = vmax.f32 %v21_v0, 0.0  ;;  %v24_v3 = vmax.f32 %v22_v1, 0.0  ;;  %s34_s19 = int_to_ptr.vmem [resolvable:$true] %s33_s19 }
  0x14   :  { %s66_s20 = scalar_lea.vmem %s34_s19, 256  ;;  %p71_p9 = scmp.lt.s32.totalorder %s34_s19, %s34_s19 }
  0x15   :  { %25 = vst [vmem:[#allocation5] sm:$0xff] %v23_v2  ;;  %26 = vst [vmem:[#allocation5 + $0x8] sm:$0xff] %v24_v3  ;;  %p67_p8 = scmp.ne.s32.totalorder %s34_s19, %s66_s20  ;;  %p72_p10 = scmp.lt.s32.totalorder %s66_s20, %s66_s20 }
  0x17   :  { %p73_p11 = por %p72_p10, %p71_p9 }
  0x19   :  { %p74_p12 = pnand %p73_p11, %p67_p8 }
  0x1b   :  { %77 = shalt.err (!%p74_p12)
}
  0x1c   :  { %s78_s22 = scalar_lea.hbm %s129_s1, 256 }
  0x1d   :  { %p79_p13 = scmp.ne.s32.totalorder %s129_s1, %s78_s22  ;;  %p82_p0 = scmp.lt.u32.totalorder %s78_s22, %s129_s1 }
  0x1f   :  { %p84_p1 = pnand %p82_p0, %p79_p13 }
  0x21   :  { %87 = shalt.err (!%p84_p1)
}
  0x22   :  { %36 = dma.vmem_to_hbm [thread:$0]  %s34_s19, 256, %s129_s1, [#allocation4]  }
  0x23   :  { %90 = dma.done.wait [#allocation4], 256  }
  0x24   :  { %91 = vsyncadd [#allocation4], 4294967040 }
  0x25   :  { %40 = vsyncpa [#allocation3], 1 }
  0x26   :  { %41 = vsyncpa [#allocation4], 1 }

</bundles_post_ra>
